<compile_context>
chip_gen: v5e
topology: v5e:2x2
jax: 0.10.0
libtpu: 0.0.40
codegen_flags: <defaults>
</compile_context>

<pallas_src>
import functools
import math

import jax
import jax.numpy as jnp
from jax.experimental import pallas as pl
from jax.experimental.pallas import tpu as pltpu


_TARGET_BLOCK_ROWS = 2048   # ~2 MiB per f32 block at N*D = 256 lanes


def _reference(h, weight):
    """Pure-JAX reference matching the PyTorch forward (also the 1-frame fast path)."""
    m = jnp.tanh(h)
    scores = jnp.matmul(m, weight)             # (..., N, 1)
    alpha = jax.nn.softmax(scores, axis=-2)    # softmax over the object axis
    return h * alpha


def _spatial_attention_kernel(h_ref, wb_ref, ex_ref, o_ref):
    """Lane-dense spatial attention.

    h_ref : (rows, N*D)  one row per (frame, direction); all N objects packed along lanes
    wb_ref: (N*D, N)     block-diagonal score weights: col j holds `weight` in rows j*D:(j+1)*D
    ex_ref: (N, N*D)     0/1 expansion matrix: row j has ones in cols j*D:(j+1)*D
    o_ref : (rows, N*D)
    """
    h = h_ref[...].astype(jnp.float32)
    m = jnp.tanh(h)                                                     # EUP tanh
    # Per-object scores (rows, N): one small matmul keeps the data lane-dense
    # (no in-kernel (rows, N, D) relayout / masked partial stores).
    scores = jnp.dot(m, wb_ref[...],
                     preferred_element_type=jnp.float32,
                     precision=jax.lax.Precision.HIGHEST)
    # Softmax over the N object lanes.
    s_max = jnp.max(scores, axis=-1, keepdims=True)
    e = jnp.exp(scores - s_max)
    denom = jnp.sum(e, axis=-1, keepdims=True)
    alpha = e / denom            # exact division: strict torch parity, free (memory-bound)
    # Expand alpha back to (rows, N*D) with a 0/1 matmul (robust lowering vs lane-repeat).
    alpha_full = jnp.dot(alpha, ex_ref[...],
                         preferred_element_type=jnp.float32,
                         precision=jax.lax.Precision.HIGHEST)
    o_ref[...] = (h * alpha_full).astype(o_ref.dtype)


def _block_diag_weights(weight, n_obj):
    """Precompute the (N*D, N) block-diag score weights and the (N, N*D) expansion."""
    d = weight.shape[0]
    w_col = weight.reshape(d, 1).astype(jnp.float32)
    eye = jnp.eye(n_obj, dtype=jnp.float32)
    wb = jnp.kron(eye, w_col)                                 # (N*D, N)
    ex = jnp.kron(eye, jnp.ones((1, d), jnp.float32))         # (N, N*D)
    return wb, ex


def _auto_rows_per_step(n_rows):
    if n_rows <= _TARGET_BLOCK_ROWS:
        return n_rows                          # single invocation, no grid machinery
    for cand in range(_TARGET_BLOCK_ROWS, 7, -8):
        if n_rows % cand == 0:
            return cand
    # TODO(synk): ragged row counts with no multiple-of-8 divisor <= target fall
    # back to one whole-array block; very large ragged inputs should pad T*B to
    # a multiple of 8 in the caller instead.
    return n_rows


@functools.partial(jax.jit, static_argnames=("rows_per_step",))
def spatial_attention_frames(h_frames, weight, *, rows_per_step=None):
    """Apply spatial attention to a stack of frames.

    h_frames: (T, B, N, D), weight: (D, 1)  ->  (T, B, N, D).
    rows_per_step: grid block size in flattened T*B rows (None = auto ~2048).
    """
    T, B, N, D = h_frames.shape
    rows, cols = T * B, N * D
    h2d = h_frames.reshape(rows, cols)                 # lane-dense, free reshape
    wb, ex = _block_diag_weights(weight, N)
    out_shape = jax.ShapeDtypeStruct((rows, cols), h_frames.dtype)

    if rows_per_step is None:
        rows_per_step = _auto_rows_per_step(rows)

    if rows_per_step >= rows:
        # Whole problem in one invocation: whole-array VMEM blocks, no grid.
        out2d = pl.pallas_call(
            _spatial_attention_kernel,
            out_shape=out_shape,
        )(h2d, wb, ex)
        return out2d.reshape(T, B, N, D)

    if rows % rows_per_step != 0 or rows_per_step % 8 != 0:
        raise ValueError(
            "rows_per_step must divide T*B and be a multiple of 8 "
            f"(got rows_per_step={rows_per_step}, T*B={rows})")

    out2d = pl.pallas_call(
        _spatial_attention_kernel,
        out_shape=out_shape,
        grid=(rows // rows_per_step,),
        in_specs=[
            pl.BlockSpec((rows_per_step, cols), lambda r: (r, 0)),
            pl.BlockSpec((cols, N), lambda r: (0, 0)),
            pl.BlockSpec((N, cols), lambda r: (0, 0)),
        ],
        out_specs=pl.BlockSpec((rows_per_step, cols), lambda r: (r, 0)),
        compiler_params=pltpu.CompilerParams(
            # Row blocks are independent -> shard across both v7x TensorCores.
            # (Pick an even grid length on v7x for perfect TC balance.)
            dimension_semantics=("parallel",),
        ),
    )(h2d, wb, ex)
    return out2d.reshape(T, B, N, D)


class SpatialAttention:
    """JAX/Pallas port of the PyTorch SpatialAttention module."""

    def __init__(self, h_dim: int, key: jax.Array):
        # nn.init.kaiming_normal_(weight, a=sqrt(5)) on a (h_dim, 1) tensor:
        # fan_in = 1, gain = sqrt(2 / (1 + a^2)), std = gain / sqrt(fan_in)
        gain = math.sqrt(2.0 / (1.0 + 5.0))
        std = gain / math.sqrt(1.0)
        self.weight = std * jax.random.normal(key, (h_dim, 1), dtype=jnp.float32)

    def __call__(self, h_all_in: dict, use_pallas: bool = False) -> dict:
        keys = list(h_all_in.keys())
        if len(keys) == 0:
            return h_all_in
        h_in = jnp.concatenate([h_all_in[k] for k in keys], axis=1)   # (B, N, D)
        if use_pallas:
            roh = spatial_attention_frames(h_in[None], self.weight)[0]
        else:
            # Per perf review: a single frame (~2 KiB) is launch-overhead bound;
            # the fused pure-JAX expression is faster.  Batch frames through
            # spatial_attention_frames to use the Pallas kernel profitably.
            roh = _reference(h_in, self.weight)
        return {k: roh[:, i : i + 1, :] for i, k in enumerate(keys)}


if __name__ == "__main__":
    key = jax.random.PRNGKey(0)
    k_w, k_x, k_t = jax.random.split(key, 3)

    B, N, D = 2, 8, 32  # 2 "directions", 8 tracked objects, hidden dim 32
    module = SpatialAttention(h_dim=D, key=k_w)

    # ---- module-style dict call (matches the torch forward contract) ----
    xs = jax.random.normal(k_x, (B, N, D), dtype=jnp.float32)
    h_all_in = {f"obj_{i}": xs[:, i : i + 1, :] for i in range(N)}
    roh_ref = _reference(xs, module.weight)

    out_fused = module(h_all_in)                          # default single-frame fast path
    roh_fused = jnp.concatenate([out_fused[f"obj_{i}"] for i in range(N)], axis=1)
    roh_fused = jax.block_until_ready(roh_fused)
    assert roh_fused.shape == (B, N, D)
    assert jnp.allclose(roh_fused, roh_ref, atol=1e-3, rtol=1e-3), (
        "fused module path mismatch vs reference")

    out_pallas = module(h_all_in, use_pallas=True)        # same dict call via the kernel
    roh_pallas = jnp.concatenate([out_pallas[f"obj_{i}"] for i in range(N)], axis=1)
    roh_pallas = jax.block_until_ready(roh_pallas)
    assert jnp.allclose(roh_pallas, roh_ref, atol=1e-3, rtol=1e-3), (
        "pallas module path mismatch vs reference")

    # ---- batched kernel path: many frames amortized over one pallas_call ----
    T = 64
    h_frames = jax.random.normal(k_t, (T, B, N, D), dtype=jnp.float32)
    ref_frames = _reference(h_frames, module.weight)

    # auto block choice: T*B = 128 rows -> single no-grid invocation
    roh_auto = jax.block_until_ready(
        spatial_attention_frames(h_frames, module.weight))
    assert roh_auto.shape == (T, B, N, D)
    assert jnp.allclose(roh_auto, ref_frames, atol=1e-3, rtol=1e-3), (
        "batched (no-grid) path mismatch vs reference")

    # explicit gridded path: grid length 2 (even -> both v7x TCs get work)
    roh_grid = jax.block_until_ready(
        spatial_attention_frames(h_frames, module.weight, rows_per_step=64))
    assert jnp.allclose(roh_grid, ref_frames, atol=1e-3, rtol=1e-3), (
        "batched (gridded) path mismatch vs reference")

    print("KERNEL_OK")
</pallas_src>

<mosaic_0001>
module attributes {stable_mosaic.version = 11 : i64} {
  func.func @_spatial_attention_kernel(%arg0: memref<2x256xf32, #tpu.memory_space<vmem>>, %arg1: memref<256x8xf32, #tpu.memory_space<vmem>>, %arg2: memref<8x256xf32, #tpu.memory_space<vmem>>, %arg3: memref<2x256xf32, #tpu.memory_space<vmem>>) attributes {dimension_semantics = [], scalar_prefetch = 0 : i64, scratch_operands = 0 : i64, tpu.core_type = #tpu.core_type<tc>} {
    %c0 = arith.constant 0 : index
    %c0_0 = arith.constant 0 : index
    %0 = vector.load %arg0[%c0, %c0_0] : memref<2x256xf32, #tpu.memory_space<vmem>>, vector<2x256xf32>
    %1 = math.tanh %0 : vector<2x256xf32>
    %c0_1 = arith.constant 0 : index
    %c0_2 = arith.constant 0 : index
    %2 = vector.load %arg1[%c0_1, %c0_2] : memref<256x8xf32, #tpu.memory_space<vmem>>, vector<256x8xf32>
    %cst = arith.constant dense<0.000000e+00> : vector<2x8xf32>
    %3 = tpu.matmul %1, %2, %cst {dimension_numbers = #tpu.dot_dimension_numbers<[1], [0], [0], [1], [0, 0, 1, 1], [], []>, precision = #tpu.contract_precision<fp32>} : vector<2x256xf32>, vector<256x8xf32>, vector<2x8xf32> -> vector<2x8xf32>
    %cst_3 = arith.constant dense<0xFF800000> : vector<2xf32>
    %4 = vector.multi_reduction <maximumf>, %3, %cst_3 [1] : vector<2x8xf32> to vector<2xf32>
    %5 = vector.shape_cast %4 : vector<2xf32> to vector<2x1xf32>
    %6 = vector.broadcast %5 : vector<2x1xf32> to vector<2x8xf32>
    %7 = arith.subf %3, %6 : vector<2x8xf32>
    %8 = math.exp %7 : vector<2x8xf32>
    %cst_4 = arith.constant dense<0.000000e+00> : vector<2xf32>
    %9 = vector.multi_reduction <add>, %8, %cst_4 [1] : vector<2x8xf32> to vector<2xf32>
    %10 = vector.shape_cast %9 : vector<2xf32> to vector<2x1xf32>
    %11 = vector.broadcast %10 : vector<2x1xf32> to vector<2x8xf32>
    %12 = arith.divf %8, %11 : vector<2x8xf32>
    %c0_5 = arith.constant 0 : index
    %c0_6 = arith.constant 0 : index
    %13 = vector.load %arg2[%c0_5, %c0_6] : memref<8x256xf32, #tpu.memory_space<vmem>>, vector<8x256xf32>
    %cst_7 = arith.constant dense<0.000000e+00> : vector<2x256xf32>
    %14 = tpu.matmul %12, %13, %cst_7 {dimension_numbers = #tpu.dot_dimension_numbers<[1], [0], [0], [1], [0, 0, 1, 1], [], []>, precision = #tpu.contract_precision<fp32>} : vector<2x8xf32>, vector<8x256xf32>, vector<2x256xf32> -> vector<2x256xf32>
    %15 = arith.mulf %0, %14 : vector<2x256xf32>
    %c0_8 = arith.constant 0 : index
    %c0_9 = arith.constant 0 : index
    %16 = vector.load %arg3[%c0_8, %c0_9] : memref<2x256xf32, #tpu.memory_space<vmem>>, vector<2x256xf32>
    tpu.vector_store %arg3[%c0_8, %c0_9], %15 {strides = array<i32>} : memref<2x256xf32, #tpu.memory_space<vmem>>, vector<2x256xf32>,
    return
  }
}

</mosaic_0001>

<bundles_post_ra>
// kernel: spatial_attention_frames.1
= control target key start
LH: loop header
LB: loop body
LE: loop exit
PB: predicated region body
PF: predicated region fallthrough
CT: control target
= control target key end

     0   :  { %vm736_vm0 = vcmask 58368   ;;  %vm763_vm5 = vcmask 64512   ;;  %vm1062_vm6 = vcmask 1041408   ;;  %s1710_s1 = inlined_call_operand.vmem [shape: f32[256,8], index: 1, kind: input, shape index: {}]   ;;  %s1711_s0 = inlined_call_operand.vmem [shape: f32[2,256], index: 0, kind: input, shape index: {}]   ;;  %s1712_s2 = inlined_call_operand.vmem [shape: f32[8,256], index: 2, kind: input, shape index: {}]   ;;  %s1713_s3 = inlined_call_operand.vmem [shape: f32[2,256], index: 3, kind: output, shape index: {}]  }
   0x1   :  { %v31_v0 = vld [vmem:[%s1710_s1 + $0x78] sm:$0xff]  ;;  %v30_v1 = vld [vmem:[%s1710_s1 + $0x70] sm:$0xff]  ;;  %v29_v2 = vld [vmem:[%s1710_s1 + $0x68] sm:$0xff] }
   0x2   :  { %v1106_v3 = vand.u32 4294901760, %v31_v0  ;;  %v1108_v4 = vand.u32 4294901760, %v30_v1  ;;  %v1110_v5 = vand.u32 4294901760, %v29_v2  ;;  %v28_v6 = vld [vmem:[%s1710_s1 + $0x60] sm:$0xff]  ;;  %v27_v7 = vld [vmem:[%s1710_s1 + $0x58] sm:$0xff]  ;;  %v26_v8 = vld [vmem:[%s1710_s1 + $0x50] sm:$0xff] }
   0x3   :  { %v1121_v9 = vand.u32 4294901760, %v28_v6  ;;  %v1123_v10 = vand.u32 4294901760, %v27_v7  ;;  %v1125_v11 = vand.u32 4294901760, %v26_v8  ;;  %v25_v12 = vld [vmem:[%s1710_s1 + $0x48] sm:$0xff]  ;;  %v24_v13 = vld [vmem:[%s1710_s1 + $0x40] sm:$0xff]  ;;  %v23_v21 = vld [vmem:[%s1710_s1 + $0x38] sm:$0xff] }
   0x4   :  { %55 = vmatpush.msra.mxu0 %v1106_v3  ;;  %v1135_v14 = vsub.f32 %v31_v0, %v1106_v3  ;;  %v1138_v15 = vsub.f32 %v30_v1, %v1108_v4  ;;  %251 = vmatpush.msra.mxu3 %v1106_v3  ;;  %v1142_v16 = vsub.f32 %v29_v2, %v1110_v5  ;;  %v1144_v17 = vand.u32 4294901760, %v25_v12  ;;  %v22_v26 = vld [vmem:[%s1710_s1 + $0x30] sm:$0xff]  ;;  %v21_v36 = vld [vmem:[%s1710_s1 + $0x28] sm:$0xff]  ;;  %v20_v42 = vld [vmem:[%s1710_s1 + $0x20] sm:$0xff] }
   0x5   :  { %v1147_v18 = vsub.f32 %v28_v6, %v1121_v9  ;;  %v1150_v19 = vsub.f32 %v27_v7, %v1123_v10  ;;  %v1152_v20 = vand.u32 4294901760, %v24_v13  ;;  %v1163_v25 = vsub.f32 %v26_v8, %v1125_v11  ;;  %v19_v48 = vld [vmem:[%s1710_s1 + $0x18] sm:$0xff]  ;;  %v18_v54 = vld [vmem:[%s1710_s1 + $0x10] sm:$0xff]  ;;  %v17_v59 = vld [vmem:[%s1710_s1 + $0x8] sm:$0xff] }
   0x6   :  { %57 = vmatpush.msra.mxu0 %v1108_v4  ;;  %198 = vmatpush.msra.mxu2 %v1135_v14  ;;  %v97_v22 = vand.u32 4294901760, %v1135_v14  ;;  %v1729_v23 = vand.u32 4294901760, %v1138_v15  ;;  %v1728_v24 = vand.u32 4294901760, %v1142_v16  ;;  %v1172_v29 = vsub.f32 %v25_v12, %v1144_v17  ;;  %v47_v60 = vld [vmem:[%s1710_s1 + $0xf8] sm:$0xff]  ;;  %v46_v2 = vld [vmem:[%s1710_s1 + $0xf0] sm:$0xff]  ;;  %v16_v7 = vld [vmem:[%s1710_s1] sm:$0xff] }
   0x7   :  { %253 = vmatpush.msra.mxu3 %v1108_v4  ;;  %v1726_v27 = vand.u32 4294901760, %v1147_v18  ;;  %v1723_v28 = vand.u32 4294901760, %v1150_v19  ;;  %v1185_v33 = vand.u32 4294901760, %v23_v21  ;;  %v1188_v34 = vand.u32 4294901760, %v22_v26 }
   0x8   :  { %59 = vmatpush.msra.mxu0 %v1110_v5  ;;  %201 = vmatpush.msra.mxu2 %v1138_v15  ;;  %v98_v30 = vsub.f32 %v1135_v14, %v97_v22  ;;  %v104_v31 = vsub.f32 %v1138_v15, %v1729_v23  ;;  %v110_v32 = vsub.f32 %v1142_v16, %v1728_v24  ;;  %v1722_v40 = vand.u32 4294901760, %v1163_v25 }
   0x9   :  { %255 = vmatpush.msra.mxu3 %v1110_v5  ;;  %v1191_v35 = vsub.f32 %v24_v13, %v1152_v20  ;;  %v116_v39 = vsub.f32 %v1147_v18, %v1726_v27  ;;  %v122_v41 = vsub.f32 %v1150_v19, %v1723_v28  ;;  %v1210_v44 = vand.u32 4294901760, %v21_v36 }
   0xa   :  { %61 = vmatpush.msra.mxu0 %v1121_v9  ;;  %v99_v37 = vand.u32 4294901760, %v98_v30  ;;  %204 = vmatpush.msra.mxu2 %v1142_v16  ;;  %v105_v38 = vand.u32 4294901760, %v104_v31  ;;  %v111_v43 = vand.u32 4294901760, %v110_v32  ;;  %v1721_v45 = vand.u32 4294901760, %v1172_v29  ;;  %v45_v32 = vld [vmem:[%s1710_s1 + $0xe8] sm:$0xff] }
   0xb   :  { %257 = vmatpush.msra.mxu3 %v1121_v9  ;;  %v1214_v46 = vsub.f32 %v23_v21, %v1185_v33  ;;  %v1719_v47 = vand.u32 4294901760, %v1191_v35  ;;  %v117_v49 = vand.u32 4294901760, %v116_v39  ;;  %v128_v50 = vsub.f32 %v1163_v25, %v1722_v40 }
   0xc   :  { %63 = vmatpush.msra.mxu0 %v1123_v10  ;;  %100 = vmatpush.msra.mxu1 %v99_v37  ;;  %v1226_v51 = vand.u32 4294901760, %v20_v42  ;;  %v1229_v52 = vsub.f32 %v22_v26, %v1188_v34  ;;  %v123_v53 = vand.u32 4294901760, %v122_v41  ;;  %v134_v55 = vsub.f32 %v1172_v29, %v1721_v45  ;;  %v44_v41 = vld [vmem:[%s1710_s1 + $0xe0] sm:$0xff] }
   0xd   :  { %207 = vmatpush.msra.mxu2 %v1147_v18  ;;  %259 = vmatpush.msra.mxu3 %v1123_v10  ;;  %v1240_v56 = vand.u32 4294901760, %v19_v48  ;;  %v1718_v57 = vand.u32 4294901760, %v1214_v46  ;;  %v1244_v58 = vsub.f32 %v21_v36, %v1210_v44  ;;  %v140_v61 = vsub.f32 %v1191_v35, %v1719_v47 }
   0xe   :  { %65 = vmatpush.msra.mxu0 %v1125_v11  ;;  %106 = vmatpush.msra.mxu1 %v105_v38  ;;  %v129_v62 = vand.u32 4294901760, %v128_v50  ;;  %v1258_v63 = vand.u32 4294901760, %v18_v54  ;;  %v1716_v0 = vand.u32 4294901760, %v1229_v52  ;;  %v1262_v1 = vsub.f32 %v20_v42, %v1226_v51 }
   0xf   :  { %210 = vmatpush.msra.mxu2 %v1150_v19  ;;  %261 = vmatpush.msra.mxu3 %v1125_v11  ;;  %v1269_v6 = vand.u32 4294901760, %v17_v59  ;;  %v1274_v8 = vand.u32 4294901760, %v47_v60  ;;  %v135_v12 = vand.u32 4294901760, %v134_v55  ;;  %v146_v13 = vsub.f32 %v1214_v46, %v1718_v57 }
  0x10   :  { %67 = vmatpush.msra.mxu0 %v1144_v17  ;;  %112 = vmatpush.msra.mxu1 %v111_v43  ;;  %v1715_v21 = vand.u32 4294901760, %v1244_v58  ;;  %v1282_v26 = vsub.f32 %v19_v48, %v1240_v56  ;;  %v141_v30 = vand.u32 4294901760, %v140_v61  ;;  %v1286_v31 = vand.u32 4294901760, %v46_v2 }
  0x11   :  { %213 = vmatpush.msra.mxu2 %v1163_v25  ;;  %263 = vmatpush.msra.mxu3 %v1144_v17  ;;  %v152_v36 = vsub.f32 %v1229_v52, %v1716_v0  ;;  %v1295_v37 = vand.u32 4294901760, %v16_v7  ;;  %v1714_v38 = vand.u32 4294901760, %v1262_v1  ;;  %v1299_v39 = vsub.f32 %v18_v54, %v1258_v63  ;;  %v41_v0 = vld [vmem:[%s1710_s1 + $0xc8] sm:$0xff] }
  0x12   :  { %69 = vmatpush.msra.mxu0 %v1152_v20  ;;  %118 = vmatpush.msra.mxu1 %v117_v49  ;;  %1736 = vst [vmem:[#allocation2_spill] sm:$0xff] %v1286_v31  ;;  %v1307_v42 = vsub.f32 %v17_v59, %v1269_v6  ;;  %v1310_v43 = vsub.f32 %v47_v60, %v1274_v8  ;;  %v147_v48 = vand.u32 4294901760, %v146_v13  ;;  %v1717_v50 = vand.u32 4294901760, %v1282_v26  ;;  %v43_v59 = vld [vmem:[%s1710_s1 + $0xd8] sm:$0xff] }
  0x13   :  { %216 = vmatpush.msra.mxu2 %v1172_v29  ;;  %265 = vmatpush.msra.mxu3 %v1152_v20  ;;  %v158_v49 = vsub.f32 %v1244_v58, %v1715_v21  ;;  %v1322_v54 = vsub.f32 %v46_v2, %v1286_v31  ;;  %v1324_v55 = vand.u32 4294901760, %v44_v41  ;;  %v153_v60 = vand.u32 4294901760, %v152_v36 }
  0x14   :  { %71 = vmatpush.msra.mxu0 %v1185_v33  ;;  %124 = vmatpush.msra.mxu1 %v123_v53  ;;  %v1317_v53 = vand.u32 4294901760, %v45_v32  ;;  %v164_v61 = vsub.f32 %v1262_v1, %v1714_v38  ;;  %v1725_v2 = vand.u32 4294901760, %v1307_v42  ;;  %v1724_v13 = vand.u32 4294901760, %v1310_v43 }
  0x15   :  { %219 = vmatpush.msra.mxu2 %v1191_v35  ;;  %267 = vmatpush.msra.mxu3 %v1185_v33  ;;  %v159_v36 = vand.u32 4294901760, %v158_v49  ;;  %v1351_v21 = vand.u32 4294901760, %v43_v59  ;;  %v1360_v49 = vsub.f32 %v44_v41, %v1324_v55 }
  0x16   :  { %73 = vmatpush.msra.mxu0 %v1188_v34  ;;  %130 = vmatpush.msra.mxu1 %v129_v62  ;;  %v1720_v62 = vand.u32 4294901760, %v1299_v39  ;;  %v1349_v38 = vsub.f32 %v45_v32, %v1317_v53  ;;  %v165_v32 = vand.u32 4294901760, %v164_v61  ;;  %v182_v41 = vsub.f32 %v1307_v42, %v1725_v2 }
  0x17   :  { %222 = vmatpush.msra.mxu2 %v1214_v46  ;;  %269 = vmatpush.msra.mxu3 %v1188_v34  ;;  %v1377_v61 = vand.u32 4294901760, %v41_v0  ;;  %v1385_v28 = vsub.f32 %v43_v59, %v1351_v21 }
  0x18   :  { %75 = vmatpush.msra.mxu0 %v1210_v44  ;;  %136 = vmatpush.msra.mxu1 %v135_v12  ;;  %v1335_v12 = vsub.f32 %v16_v7, %v1295_v37  ;;  %v170_v7 = vsub.f32 %v1282_v26, %v1717_v50  ;;  %v176_v50 = vsub.f32 %v1299_v39, %v1720_v62  ;;  %v40_v62 = vld [vmem:[%s1710_s1 + $0xc0] sm:$0xff]  ;;  %v183_v2 = vand.u32 4294901760, %v182_v41 }
  0x19   :  { %225 = vmatpush.msra.mxu2 %v1229_v52  ;;  %271 = vmatpush.msra.mxu3 %v1210_v44  ;;  %v1408_v24 = vand.u32 4294901760, %v40_v62  ;;  %v1414_v40 = vsub.f32 %v41_v0, %v1377_v61  ;;  %v1739_v0 = vand.u32 4294901760, %v1138_v15  ;;  %v1742_v14 = vand.u32 4294901760, %v1385_v28 }
  0x1a   :  { %77 = vmatpush.msra.mxu0 %v1226_v51  ;;  %142 = vmatpush.msra.mxu1 %v141_v30  ;;  %v42_v30 = vld [vmem:[%s1710_s1 + $0xd0] sm:$0xff]  ;;  %v1730_v57 = vand.u32 4294901760, %v1335_v12  ;;  %v171_v45 = vand.u32 4294901760, %v170_v7  ;;  %v1399_v7 = vld [vmem:[%s1711_s0] sm:$0xf]  ;;  %v177_v59 = vand.u32 4294901760, %v176_v50 }
  0x1b   :  { %228 = vmatpush.msra.mxu2 %v1244_v58  ;;  %273 = vmatpush.msra.mxu3 %v1226_v51  ;;  %v1367_v47 = vand.u32 4294901760, %v42_v30  ;;  %1737 = vst [vmem:[#allocation3_spill] sm:$0xff] %v1399_v7  ;;  %v38_v50 = vld [vmem:[%s1710_s1 + $0xb0] sm:$0xff]  ;;  %1071 = vtanh.f32 %v1399_v7  ;;  %v1439_v15 = vsub.f32 %v40_v62, %v1408_v24  ;;  %v463_v62 = vsub.f32 %v1385_v28, %v1742_v14 }
  0x1c   :  { %79 = vmatpush.msra.mxu0 %v1240_v56  ;;  %148 = vmatpush.msra.mxu1 %v147_v48  ;;  %v1727_v48 = vand.u32 4294901760, %v1322_v54  ;;  %v188_v27 = vsub.f32 %v1335_v12, %v1730_v57 }
  0x1d   :  { %231 = vmatpush.msra.mxu2 %v1262_v1  ;;  %275 = vmatpush.msra.mxu3 %v1240_v56 }
  0x1e   :  { %81 = vmatpush.msra.mxu0 %v1258_v63  ;;  %154 = vmatpush.msra.mxu1 %v153_v60  ;;  %v439_v60 = vsub.f32 %v1310_v43, %v1724_v13  ;;  %v445_v13 = vsub.f32 %v1322_v54, %v1727_v48  ;;  %v1406_v48 = vsub.f32 %v42_v30, %v1367_v47  ;;  %v1738_v30 = vand.u32 4294901760, %v1349_v38 }
  0x1f   :  { %234 = vmatpush.msra.mxu2 %v1282_v26  ;;  %277 = vmatpush.msra.mxu3 %v1258_v63  ;;  %v189_v57 = vand.u32 4294901760, %v188_v27 }
  0x20   :  { %83 = vmatpush.msra.mxu0 %v1269_v6  ;;  %160 = vmatpush.msra.mxu1 %v159_v36  ;;  %v39_v36 = vld [vmem:[%s1710_s1 + $0xb8] sm:$0xff]  ;;  %v440_v23 = vand.u32 4294901760, %v439_v60  ;;  %v446_v41 = vand.u32 4294901760, %v445_v13  ;;  %v1741_v13 = vand.u32 4294901760, %v1142_v16 }
  0x21   :  { %237 = vmatpush.msra.mxu2 %v1299_v39  ;;  %279 = vmatpush.msra.mxu3 %v1269_v6 }
  0x22   :  { %85 = vmatpush.msra.mxu0 %v1295_v37  ;;  %166 = vmatpush.msra.mxu1 %v165_v32  ;;  %v451_v32 = vsub.f32 %v1349_v38, %v1738_v30  ;;  %v37_v30 = vld [vmem:[%s1710_s1 + $0xa8] sm:$0xff] }
  0x23   :  { %240 = vmatpush.msra.mxu2 %v1307_v42  ;;  %281 = vmatpush.msra.mxu3 %v1295_v37  ;;  %v1456_v16 = vand.u32 4294901760, %v37_v30 }
  0x24   :  { %292 = vmatpush.msrb.mxu0 %v97_v22  ;;  %172 = vmatpush.msra.mxu1 %v171_v45  ;;  %v1424_v22 = vand.u32 4294901760, %v39_v36  ;;  %v1740_v45 = vand.u32 4294901760, %v1360_v49  ;;  %v452_v27 = vand.u32 4294901760, %v451_v32  ;;  %v1744_v32 = vand.u32 4294901760, %v1406_v48 }
  0x25   :  { %243 = vmatpush.msra.mxu2 %v1335_v12  ;;  %441 = vmatpush.msrb.mxu3 %v440_v23  ;;  %v1743_v23 = vand.u32 4294901760, %v1147_v18 }
  0x26   :  { %296 = vmatpush.msrb.mxu0 %v1739_v0  ;;  %v457_v60 = vsub.f32 %v1360_v49, %v1740_v45  ;;  %178 = vmatpush.msra.mxu1 %v177_v59  ;;  %v1441_v0 = vand.u32 4294901760, %v38_v50  ;;  %v36_v59 = vld [vmem:[%s1710_s1 + $0xa0] sm:$0xff]  ;;  %v1454_v7 = vsub.f32 %v39_v36, %v1424_v22  ;;  %v1072_v45 = vpop.eup %1071  ;;  %v469_v36 = vsub.f32 %v1406_v48, %v1744_v32 }
  0x27   :  { %396 = vmatpush.msrb.mxu2 %v1274_v8  ;;  %447 = vmatpush.msrb.mxu3 %v446_v41  ;;  %v1471_v18 = vand.u32 4294901760, %v36_v59  ;;  %v1745_v41 = vand.u32 4294901760, %v1150_v19  ;;  %49 = vst [vmem:[#allocation1] ss:$4 sm:$0xff] %v1072_v45  ;;  %v1747_v19 = vand.u32 4294901760, %v1163_v25  ;;  %v1749_v25 = vand.u32 4294901760, %v1172_v29 }
  0x28   :  { %300 = vmatpush.msrb.mxu0 %v1741_v13  ;;  %184 = vmatpush.msra.mxu1 %v183_v2  ;;  %v458_v13 = vand.u32 4294901760, %v457_v60  ;;  %v35_v2 = vld [vmem:[%s1710_s1 + $0x98] sm:$0xff]  ;;  %v486_v32 = vand.u32 4294901760, %v1454_v7  ;;  %v470_v45 = vand.u32 4294901760, %v469_v36 }
  0x29   :  { %398 = vmatpush.msrb.mxu2 %v1286_v31  ;;  %v1469_v31 = vsub.f32 %v38_v50, %v1441_v0  ;;  %453 = vmatpush.msrb.mxu3 %v452_v27  ;;  %v1482_v50 = vsub.f32 %v37_v30, %v1456_v16  ;;  %v1484_v14 = vand.u32 4294901760, %v35_v2  ;;  %v1748_v27 = vand.u32 4294901760, %v1439_v15 }
  0x2a   :  { %304 = vmatpush.msrb.mxu0 %v1743_v23  ;;  %190 = vmatpush.msra.mxu1 %v189_v57  ;;  %v1746_v57 = vand.u32 4294901760, %v1414_v40  ;;  %v464_v23 = vand.u32 4294901760, %v463_v62  ;;  %v487_v36 = vsub.f32 %v1454_v7, %v486_v32 }
  0x2b   :  { %400 = vmatpush.msrb.mxu2 %v1317_v53  ;;  %459 = vmatpush.msrb.mxu3 %v458_v13  ;;  %v481_v30 = vsub.f32 %v1439_v15, %v1748_v27  ;;  %v1734_v62 = vand.u32 4294901760, %v1469_v31  ;;  %v33_v13 = vld [vmem:[%s1710_s1 + $0x88] sm:$0xff]  ;;  %v1514_v29 = vsub.f32 %v35_v2, %v1484_v14 }
  0x2c   :  { %308 = vmatpush.msrb.mxu0 %v1745_v41  ;;  %359 = vmatpush.msrb.mxu1 %v1106_v3  ;;  %v475_v60 = vsub.f32 %v1414_v40, %v1746_v57  ;;  %v34_v3 = vld [vmem:[%s1710_s1 + $0x90] sm:$0xff]  ;;  %v1498_v41 = vsub.f32 %v36_v59, %v1471_v18  ;;  %v498_v59 = vand.u32 4294901760, %v1482_v50 }
  0x2d   :  { %402 = vmatpush.msrb.mxu2 %v1324_v55  ;;  %465 = vmatpush.msrb.mxu3 %v464_v23  ;;  %v1511_v57 = vand.u32 4294901760, %v34_v3  ;;  %v482_v23 = vand.u32 4294901760, %v481_v30 }
  0x2e   :  { %312 = vmatpush.msrb.mxu0 %v1747_v19  ;;  %361 = vmatpush.msrb.mxu1 %v1108_v4  ;;  %v476_v4 = vand.u32 4294901760, %v475_v60  ;;  %v32_v60 = vld [vmem:[%s1710_s1 + $0x80] sm:$0xff]  ;;  %v493_v19 = vsub.f32 %v1469_v31, %v1734_v62  ;;  %v504_v2 = vand.u32 4294901760, %v1498_v41  ;;  %v499_v30 = vsub.f32 %v1482_v50, %v498_v59 }
  0x2f   :  { %404 = vmatpush.msrb.mxu2 %v1351_v21  ;;  %471 = vmatpush.msrb.mxu3 %v470_v45  ;;  %v50_v27 = vld.sshfl [vmem:[#allocation1] sm:$0xff pattern:$0x73625140]  ;;  %v488_v45 = vand.u32 4294901760, %v487_v36  ;;  %v1540_v62 = vsub.f32 %v34_v3, %v1511_v57 }
  0x30   :  { %316 = vmatpush.msrb.mxu0 %v1749_v25  ;;  %363 = vmatpush.msrb.mxu1 %v1110_v5  ;;  %v1750_v5 = vand.u32 4294901760, %v1191_v35  ;;  %v1527_v25 = vand.u32 4294901760, %v33_v13  ;;  %v1751_v35 = vand.u32 4294901760, %v1214_v46  ;;  %v1752_v46 = vand.u32 4294901760, %v1229_v52 }
  0x31   :  { %406 = vmatpush.msrb.mxu2 %v1367_v47  ;;  %477 = vmatpush.msrb.mxu3 %v476_v4  ;;  %v494_v4 = vand.u32 4294901760, %v493_v19  ;;  %v505_v36 = vsub.f32 %v1498_v41, %v504_v2  ;;  %v1753_v52 = vand.u32 4294901760, %v1244_v58  ;;  %v516_v19 = vand.u32 4294901760, %v1540_v62 }
  0x32   :  { %320 = vmatpush.msrb.mxu0 %v1750_v5  ;;  %365 = vmatpush.msrb.mxu1 %v1121_v9  ;;  %v1532_v9 = vand.u32 4294901760, %v50_v27  ;;  %v1735_v5 = vand.u32 4294901760, %v1514_v29  ;;  %v1553_v3 = vsub.f32 %v33_v13, %v1527_v25  ;;  %v1754_v13 = vand.u32 4294901760, %v1262_v1 }
  0x33   :  { %408 = vmatpush.msrb.mxu2 %v1377_v61  ;;  %483 = vmatpush.msrb.mxu3 %v482_v23  ;;  %v517_v1 = vsub.f32 %v1540_v62, %v516_v19 }
  0x34   :  { %324 = vmatpush.msrb.mxu0 %v1751_v35  ;;  %367 = vmatpush.msrb.mxu1 %v1123_v10  ;;  %v87_v10 = vsub.f32 %v50_v27, %v1532_v9  ;;  %v1546_v35 = vand.u32 4294901760, %v32_v60  ;;  %v51_v27 = vld.sshfl [vmem:[#allocation1 + $0x8] sm:$0xff pattern:$0x73625140]  ;;  %v511_v23 = vsub.f32 %v1514_v29, %v1735_v5  ;;  %v1755_v5 = vand.u32 4294901760, %v1282_v26 }
  0x35   :  { %410 = vmatpush.msrb.mxu2 %v1408_v24  ;;  %489 = vmatpush.msrb.mxu3 %v488_v45 }
  0x36   :  { %328 = vmatpush.msrb.mxu0 %v1752_v46  ;;  %369 = vmatpush.msrb.mxu1 %v1125_v11  ;;  %v88_v11 = vand.u32 4294901760, %v87_v10  ;;  %v500_v46 = vand.u32 4294901760, %v499_v30  ;;  %v1567_v58 = vsub.f32 %v32_v60, %v1546_v35  ;;  %v522_v30 = vand.u32 4294901760, %v1553_v3 }
  0x37   :  { %412 = vmatpush.msrb.mxu2 %v1424_v22  ;;  %495 = vmatpush.msrb.mxu3 %v494_v4  ;;  %v1756_v60 = vand.u32 4294901760, %v1299_v39  ;;  %v1758_v39 = vand.u32 4294901760, %v1335_v12  ;;  %v1759_v12 = vand.u32 4294901760, %v1310_v43 }
  0x38   :  { %332 = vmatpush.msrb.mxu0 %v1753_v52  ;;  %371 = vmatpush.msrb.mxu1 %v1144_v17  ;;  %v506_v17 = vand.u32 4294901760, %v505_v36  ;;  %v89_v45 = vsub.f32 %v87_v10, %v88_v11  ;;  %v1571_v52 = vand.u32 4294901760, %v51_v27  ;;  %v528_v4 = vand.u32 4294901760, %v1567_v58 }
  0x39   :  { %414 = vmatpush.msrb.mxu2 %v1441_v0  ;;  %501 = vmatpush.msrb.mxu3 %v500_v46  ;;  %v1757_v36 = vand.u32 4294901760, %v1307_v42 }
  0x3a   :  { %336 = vmatpush.msrb.mxu0 %v1754_v13  ;;  %373 = vmatpush.msrb.mxu1 %v1152_v20  ;;  %v512_v20 = vand.u32 4294901760, %v511_v23  ;;  %v90_v26 = vand.u32 4294901760, %v89_v45  ;;  %v529_v46 = vsub.f32 %v1567_v58, %v528_v4  ;;  %v761_v23 = vld [vmem:[%s1712_s2] sm:$0xff] }
  0x3b   :  { %416 = vmatpush.msrb.mxu2 %v1456_v16  ;;  %507 = vmatpush.msrb.mxu3 %v506_v17 }
  0x3c   :  { %340 = vmatpush.msrb.mxu0 %v1755_v5  ;;  %375 = vmatpush.msrb.mxu1 %v1185_v33  ;;  %v523_v33 = vsub.f32 %v1553_v3, %v522_v30  ;;  %v1589_v5 = vsub.f32 %v51_v27, %v1571_v52 }
  0x3d   :  { %418 = vmatpush.msrb.mxu2 %v1471_v18  ;;  %513 = vmatpush.msrb.mxu3 %v512_v20 }
  0x3e   :  { %344 = vmatpush.msrb.mxu0 %v1756_v60  ;;  %377 = vmatpush.msrb.mxu1 %v1188_v34  ;;  %v518_v34 = vand.u32 4294901760, %v517_v1  ;;  %v524_v42 = vand.u32 4294901760, %v523_v33  ;;  %v429_v27 = vand.u32 4294901760, %v1589_v5 }
  0x3f   :  { %420 = vmatpush.msrb.mxu2 %v1484_v14  ;;  %91 = vmatmul.f32.vlgmr.msra.gmra.mxu0 %v90_v26 }
  0x40   :  { %348 = vmatpush.msrb.mxu0 %v1757_v36  ;;  %379 = vmatpush.msrb.mxu1 %v1210_v44  ;;  %v530_v44 = vand.u32 4294901760, %v529_v46 }
  0x41   :  { %422 = vmatpush.msrb.mxu2 %v1511_v57  ;;  %519 = vmatpush.msrb.mxu3 %v518_v34 }
  0x42   :  { %352 = vmatpush.msrb.mxu0 %v1758_v39  ;;  %381 = vmatpush.msrb.mxu1 %v1226_v51  ;;  %v430_v51 = vsub.f32 %v1589_v5, %v429_v27 }
  0x43   :  { %424 = vmatpush.msrb.mxu2 %v1527_v25  ;;  %525 = vmatpush.msrb.mxu3 %v524_v42 }
  0x44   :  { %539 = vmatpush.msra.mxu0 %v1310_v43  ;;  %383 = vmatpush.msrb.mxu1 %v1240_v56  ;;  %v1760_v56 = vand.u32 4294901760, %v1322_v54  ;;  %v1761_v43 = vand.u32 4294901760, %v1349_v38 }
  0x45   :  { %246 = vmatmul.f32.vlgmr.msra.gmra.mxu2 %v87_v10  ;;  %285 = vmatmul.f32.vlgmr.msra.gmra.mxu3 %v88_v11 }
  0x46   :  { %542 = vmatpush.msra.mxu0 %v1322_v54  ;;  %385 = vmatpush.msrb.mxu1 %v1258_v63  ;;  %v431_v63 = vand.u32 4294901760, %v430_v51  ;;  %v1763_v54 = vand.u32 4294901760, %v1360_v49 }
  0x47   :  { %426 = vmatpush.msrb.mxu2 %v1546_v35  ;;  %531 = vmatpush.msrb.mxu3 %v530_v44 }
  0x48   :  { %545 = vmatpush.msra.mxu0 %v1349_v38  ;;  %387 = vmatpush.msrb.mxu1 %v1269_v6  ;;  %v1762_v6 = vld [vmem:[#allocation2_spill] sm:$0xff]  ;;  %v1767_v38 = vand.u32 4294901760, %v1439_v15 }
  0x49   :  { %633 = vmatpush.msra.mxu2 %v1759_v12  ;;  %192 = vmatmul.f32.vlgmr.msra.gmra.mxu1 %v1532_v9 }
  0x4a   :  { %548 = vmatpush.msra.mxu0 %v1360_v49  ;;  %700 = vmatpush.msra.mxu3 %v1274_v8 }
  0x4b   :  { %637 = vmatpush.msra.mxu2 %v1760_v56  ;;  %389 = vmatpush.msrb.mxu1 %v1295_v37  ;;  %v1765_v37 = vand.u32 4294901760, %v1406_v48 }
  0x4c   :  { %551 = vmatpush.msra.mxu0 %v1385_v28  ;;  %702 = vmatpush.msra.mxu3 %v1762_v6 }
  0x4d   :  { %592 = vmatpush.msra.mxu1 %v1274_v8  ;;  %641 = vmatpush.msra.mxu2 %v1761_v43  ;;  %v1764_v8 = vand.u32 4294901760, %v1385_v28  ;;  %v1766_v28 = vand.u32 4294901760, %v1414_v40 }
  0x4e   :  { %432 = vmatmul.f32.vlgmr.msrb.gmra.mxu2 %v431_v63  ;;  %554 = vmatpush.msra.mxu0 %v1406_v48 }
  0x4f   :  { %594 = vmatpush.msra.mxu1 %v1762_v6  ;;  %645 = vmatpush.msra.mxu2 %v1763_v54 }
  0x50   :  { %704 = vmatpush.msra.mxu3 %v1317_v53  ;;  %354 = vmatmul.f32.vlgmr.msrb.gmra.mxu0 %v1532_v9 }
  0x51   :  { %533 = vmatmul.f32.vlgmr.msrb.gmra.mxu3 %v1571_v52  ;;  %557 = vmatpush.msra.mxu0 %v1414_v40  ;;  %v1768_v40 = vand.u32 4294901760, %v1469_v31 }
  0x52   :  { %596 = vmatpush.msra.mxu1 %v1317_v53  ;;  %649 = vmatpush.msra.mxu2 %v1764_v8 }
  0x53   :  { %706 = vmatpush.msra.mxu3 %v1324_v55  ;;  %391 = vmatmul.f32.vlgmr.msrb.gmra.mxu1 %v1532_v9 }
  0x54   :  { %560 = vmatpush.msra.mxu0 %v1439_v15  ;;  %598 = vmatpush.msra.mxu1 %v1324_v55 }
  0x55   :  { %653 = vmatpush.msra.mxu2 %v1765_v37  ;;  %708 = vmatpush.msra.mxu3 %v1351_v21 }
  0x56   :  { %563 = vmatpush.msra.mxu0 %v1454_v7  ;;  %600 = vmatpush.msra.mxu1 %v1351_v21 }
  0x57   :  { %657 = vmatpush.msra.mxu2 %v1766_v28  ;;  %710 = vmatpush.msra.mxu3 %v1367_v47 }
  0x58   :  { %566 = vmatpush.msra.mxu0 %v1469_v31  ;;  %602 = vmatpush.msra.mxu1 %v1367_v47 }
  0x59   :  { %661 = vmatpush.msra.mxu2 %v1767_v38  ;;  %712 = vmatpush.msra.mxu3 %v1377_v61 }
  0x5a   :  { %569 = vmatpush.msra.mxu0 %v1482_v50  ;;  %604 = vmatpush.msra.mxu1 %v1377_v61 }
  0x5b   :  { %665 = vmatpush.msra.mxu2 %v486_v32  ;;  %714 = vmatpush.msra.mxu3 %v1408_v24 }
  0x5c   :  { %572 = vmatpush.msra.mxu0 %v1498_v41  ;;  %606 = vmatpush.msra.mxu1 %v1408_v24  ;;  %v1769_v24 = vand.u32 4294901760, %v1514_v29 }
  0x5d   :  { %669 = vmatpush.msra.mxu2 %v1768_v40  ;;  %716 = vmatpush.msra.mxu3 %v1424_v22 }
  0x5e   :  { %575 = vmatpush.msra.mxu0 %v1514_v29  ;;  %608 = vmatpush.msra.mxu1 %v1424_v22 }
  0x5f   :  { %673 = vmatpush.msra.mxu2 %v498_v59  ;;  %718 = vmatpush.msra.mxu3 %v1441_v0 }
  0x60   :  { %578 = vmatpush.msra.mxu0 %v1540_v62  ;;  %610 = vmatpush.msra.mxu1 %v1441_v0 }
  0x61   :  { %677 = vmatpush.msra.mxu2 %v504_v2  ;;  %720 = vmatpush.msra.mxu3 %v1456_v16 }
  0x62   :  { %581 = vmatpush.msra.mxu0 %v1553_v3  ;;  %612 = vmatpush.msra.mxu1 %v1456_v16 }
  0x63   :  { %681 = vmatpush.msra.mxu2 %v1769_v24  ;;  %722 = vmatpush.msra.mxu3 %v1471_v18 }
  0x64   :  { %584 = vmatpush.msra.mxu0 %v1567_v58  ;;  %614 = vmatpush.msra.mxu1 %v1471_v18 }
  0x65   :  { %685 = vmatpush.msra.mxu2 %v516_v19  ;;  %724 = vmatpush.msra.mxu3 %v1484_v14  ;;  %v782_v19 = vand.u32 4294901760, %v761_v23 }
  0x66   :  { %587 = vmatmul.f32.vlgmr.msra.gmra.mxu0 %v1589_v5  ;;  %616 = vmatpush.msra.mxu1 %v1484_v14 }
  0x67   :  { %689 = vmatpush.msra.mxu2 %v522_v30  ;;  %726 = vmatpush.msra.mxu3 %v1511_v57  ;;  %v809_v13 = vsub.f32 %v761_v23, %v782_v19  ;;  %v762_v30 = vld [vmem:[%s1712_s2 + $0x8] sm:$0xff] }
  0x68   :  { %618 = vmatpush.msra.mxu1 %v1511_v57  ;;  %783 = vmatpush.msrb.mxu0 %v782_v19 }
  0x69   :  { %693 = vmatpush.msra.mxu2 %v528_v4  ;;  %728 = vmatpush.msra.mxu3 %v1527_v25  ;;  %v810_v58 = vand.u32 4294901760, %v809_v13 }
  0x6a   :  { %695 = vmatmul.f32.vlgmr.msra.gmra.mxu2 %v1571_v52  ;;  %620 = vmatpush.msra.mxu1 %v1527_v25 }
  0x6b   :  { %730 = vmatpush.msra.mxu3 %v1546_v35  ;;  %836 = vmatpush.msrb.mxu2 %v809_v13  ;;  %v811_v17 = vsub.f32 %v809_v13, %v810_v58 }
  0x6c   :  { %732 = vmatmul.f32.vlgmr.msra.gmra.mxu3 %v1571_v52  ;;  %622 = vmatpush.msra.mxu1 %v1546_v35  ;;  %v928_v52 = vand.u32 4294901760, %v762_v30 }
  0x6d   :  { %626 = vmatmul.f32.vlgmr.msra.gmra.mxu1 %v429_v27  ;;  %859 = vmatpush.msrb.mxu3 %v782_v19  ;;  %v812_v45 = vand.u32 4294901760, %v811_v17 }
  0x6e   :  { %885 = vmatpush.msra.mxu0 %v810_v58  ;;  %929 = vmatpush.msra.mxu2 %v928_v52  ;;  %v955_v20 = vsub.f32 %v762_v30, %v928_v52 }
  0x6f   :  { %813 = vmatpush.msrb.mxu1 %v812_v45 }
  0x70   :  { %v956_v1 = vand.u32 4294901760, %v955_v20 }
  0x71   :  { %907 = vmatpush.msra.mxu1 %v782_v19 }
  0x72   :  { %v957_v60 = vsub.f32 %v955_v20, %v956_v1 }
  0x74   :  { %v958_v26 = vand.u32 4294901760, %v957_v60 }
  0x76   :  { %959 = vmatpush.msra.mxu3 %v958_v26 }
  0xbc   :  { %v92_v21 = vpop.f32.mrf.mxu0 }
  0xc6   :  { %v193_v47 = vpop.f32.mrf.mxu1 }
  0xc7   :  { %v194_v31 = vadd.f32 %v193_v47, %v92_v21 }
  0xc8   :  { %v247_v53 = vpop.f32.mrf.mxu2  ;;  %v286_v48 = vpop.f32.mrf.mxu3 }
  0xc9   :  { %v248_v55 = vadd.f32 %v247_v53, %v194_v31 }
  0xcb   :  { %v287_v49 = vadd.f32 %v286_v48, %v248_v55 }
  0xcd   :  { %v355_v61 = vpop.f32.mrf.mxu0 }
  0xce   :  { %v356_v7 = vadd.f32 %v355_v61, %v287_v49 }
  0xd0   :  { %v392_v22 = vpop.f32.mrf.mxu1 }
  0xd1   :  { %v393_v15 = vadd.f32 %v392_v22, %v356_v7  ;;  %v433_v0 = vpop.f32.mrf.mxu2 }
  0xd3   :  { %v434_v16 = vadd.f32 %v433_v0, %v393_v15 }
  0xd4   :  { %v534_v14 = vpop.f32.mrf.mxu3 }
  0xd5   :  { %v535_v32 = vadd.f32 %v534_v14, %v434_v16 }
  0xe3   :  { %v588_v18 = vpop.f32.mrf.mxu0 }
  0xe4   :  { %v589_v50 = vadd.f32 %v588_v18, %v535_v32 }
  0xea   :  { %v627_v62 = vpop.f32.mrf.mxu1 }
  0xeb   :  { %v628_v41 = vadd.f32 %v627_v62, %v589_v50 }
  0xed   :  { %v696_v59 = vpop.f32.mrf.mxu2 }
  0xee   :  { %v697_v57 = vadd.f32 %v696_v59, %v628_v41  ;;  %v1770_v59 = vld [vmem:[#allocation3_spill] sm:$0xff] }
  0xef   :  { %v733_v29 = vpop.f32.mrf.mxu3 }
  0xf0   :  { %v734_v2 = vadd.f32 %v733_v29, %v697_v57 }
  0xf2   :  { %v737_v25 = vsel %vm736_vm0, %v734_v2, -inf }
  0xf3   :  { %738 = vmax.xlane.f32.xlu0 %v737_v25 }
 0x166   :  { %v739_v9 = vpop.xlane.xlu0 %738 }
 0x167   :  { %v740_v10 = vsub.f32 %v734_v2, %v739_v9 }
 0x169   :  { %v741_v35 = vmul.f32 1.442695, %v740_v10 }
 0x16b   :  { %1073 = vpow2.f32 %v741_v35 }
 0x171   :  { %v1074_v3 = vpop.eup %1073 }
 0x172   :  { %v743_v11 = vsel %vm736_vm0, %v1074_v3, 0.0 }
 0x173   :  { %744 = vadd.xlane.f32.xlu0 %v743_v11 }
 0x1e6   :  { %v745_v4 = vpop.xlane.xlu0 %744 }
 0x1e7   :  { %1075 = vrcp.f32 %v745_v4  ;;  %v757_v34 = vand.u32 2147483648, %v745_v4  ;;  %v755_v46 = vand.u32 2147483647, %v745_v4  ;;  %vm751_vm2 = vweird.f32 %v745_v4 }
 0x1e9   :  { %v758_v27 = vor.u32 1.1754944e-38, %v757_v34  ;;  %vm756_vm4 = vcmp.eq.f32.partialorder %v755_v46, 8.507059e+37 }
 0x1ed   :  { %v1076_v33 = vpop.eup %1075 }
 0x1ee   :  { %v747_v5 = vmul.f32 %v1076_v33, %v745_v4  ;;  %vm752_vm1 = vweird.f32 %v1076_v33 }
 0x1ef   :  { %vm753_vm3 = vmor %vm751_vm2, %vm752_vm1 }
 0x1f0   :  { %v748_v36 = vsub.f32 1.0, %v747_v5 }
 0x1f2   :  { %v749_v39 = vmul.f32 %v1076_v33, %v748_v36 }
 0x1f4   :  { %v750_v42 = vadd.f32 %v1076_v33, %v749_v39 }
 0x1f6   :  { %v754_v44 = vsel %vm753_vm3, %v1076_v33, %v750_v42 }
 0x1f7   :  { %v759_v51 = vsel %vm756_vm4, %v758_v27, %v754_v44 }
 0x1f8   :  { %v760_v12 = vmul.f32 %v1074_v3, %v759_v51 }
 0x1fa   :  { %v765_v56 = vsel %vm763_vm5, %v760_v12, 0 }
 0x1fb   :  { %v784_v63 = vand.u32 4294901760, %v765_v56 }
 0x1fd   :  { %815 = vmatmul.f32.vlgmr.msrb.gmra.mxu1 %v784_v63  ;;  %v785_v43 = vsub.f32 %v765_v56, %v784_v63 }
 0x1fe   :  { %1005 = vmatpush.msrb.mxu1 %v928_v52 }
 0x1ff   :  { %839 = vmatmul.f32.vlgmr.msrb.gmra.mxu2 %v785_v43  ;;  %v786_v6 = vand.u32 4294901760, %v785_v43 }
 0x200   :  { %1031 = vmatpush.msrb.mxu2 %v956_v1 }
 0x201   :  { %863 = vmatmul.f32.vlgmr.msrb.gmra.mxu3 %v786_v6  ;;  %v787_v54 = vsub.f32 %v785_v43, %v786_v6 }
 0x202   :  { %1053 = vmatpush.msrb.mxu3 %v928_v52 }
 0x203   :  { %v788_v8 = vand.u32 4294901760, %v787_v54 }
 0x205   :  { %789 = vmatmul.f32.vlgmr.msrb.gmra.mxu0 %v788_v8  ;;  %909 = vmatmul.f32.vlgmr.msra.gmra.mxu1 %v784_v63 }
 0x206   :  { %982 = vmatpush.msrb.mxu0 %v955_v20 }
 0x207   :  { %935 = vmatmul.f32.vlgmr.msra.gmra.mxu2 %v788_v8 }
 0x209   :  { %961 = vmatmul.f32.vlgmr.msra.gmra.mxu3 %v784_v63 }
 0x20d   :  { %887 = vmatmul.f32.vlgmr.msra.gmra.mxu0 %v784_v63  ;;  %1009 = vmatmul.f32.vlgmr.msrb.gmra.mxu1 %v786_v6 }
 0x20f   :  { %1033 = vmatmul.f32.vlgmr.msrb.gmra.mxu2 %v784_v63 }
 0x211   :  { %1055 = vmatmul.f32.vlgmr.msrb.gmra.mxu3 %v784_v63 }
 0x215   :  { %985 = vmatmul.f32.vlgmr.msrb.gmra.mxu0 %v785_v43 }
 0x27a   :  { %v816_v37 = vpop.f32.mrf.mxu1 }
 0x282   :  { %v790_v28 = vpop.f32.mrf.mxu0  ;;  %v840_v38 = vpop.f32.mrf.mxu2 }
 0x283   :  { %v910_v24 = vpop.f32.mrf.mxu1  ;;  %v817_v31 = vadd.f32 %v816_v37, %v790_v28 }
 0x284   :  { %v864_v40 = vpop.f32.mrf.mxu3 }
 0x285   :  { %v841_v55 = vadd.f32 %v840_v38, %v817_v31 }
 0x287   :  { %v865_v22 = vadd.f32 %v864_v40, %v841_v55 }
 0x28a   :  { %v888_v47 = vpop.f32.mrf.mxu0  ;;  %v936_v21 = vpop.f32.mrf.mxu2 }
 0x28b   :  { %v1010_v7 = vpop.f32.mrf.mxu1  ;;  %v889_v16 = vadd.f32 %v888_v47, %v865_v22 }
 0x28c   :  { %v962_v53 = vpop.f32.mrf.mxu3 }
 0x28d   :  { %v963_v48 = vadd.f32 %v962_v53, %v936_v21  ;;  %v911_v50 = vadd.f32 %v910_v24, %v889_v16 }
 0x292   :  { %v986_v49 = vpop.f32.mrf.mxu0  ;;  %v1034_v0 = vpop.f32.mrf.mxu2 }
 0x293   :  { %v987_v61 = vadd.f32 %v986_v49, %v963_v48 }
 0x294   :  { %v1056_v18 = vpop.f32.mrf.mxu3 }
 0x295   :  { %v1011_v15 = vadd.f32 %v1010_v7, %v987_v61 }
 0x297   :  { %v1035_v14 = vadd.f32 %v1034_v0, %v1011_v15 }
 0x299   :  { %v1057_v32 = vadd.f32 %v1056_v18, %v1035_v14 }
 0x29b   :  { %v1061_v62 = vrot.slane %v1057_v32, 6 }
 0x29d   :  { %v1063_v41 = vsel %vm1062_vm6, %v911_v50, %v1061_v62 }
 0x29e   :  { %v1065_v57 = vmul.f32 %v1063_v41, %v1770_v59 }
 0x2a0   :  { %1066 = vst [vmem:[%s1713_s3] sm:$0xf] %v1065_v57 }

</bundles_post_ra>
